<compile_context>
chip_gen: v7x
topology: tpu7x:2x2x1
jax: 0.10.0
libtpu: 0.0.40
codegen_flags: <defaults>
</compile_context>

<pallas_src>
import functools
import math

import jax
import jax.numpy as jnp
from jax.experimental import pallas as pl
from jax.experimental.pallas import tpu as pltpu


def lightgcn_layer_kernel(a_ref, e_ref, acc_in_ref, e_out_ref, acc_out_ref,
                          acc_scratch):
    """One (non-final) propagation layer tile-step.

    Grid = (row_tiles, k_tiles); K (reduction) axis is last / "arbitrary".
      a_ref:       [tm, tk] bf16  adjacency tile        (i, k)
      e_ref:       [tk, D]  bf16  previous-layer E tile (k, 0)
      acc_in_ref:  [tm, D]  f32   running layer sum     (i, 0)
      e_out_ref:   [tm, D]  bf16  E_k row tile          (i, 0)
      acc_out_ref: [tm, D]  f32   updated running sum   (i, 0)  (aliased with acc_in)
      acc_scratch: [tm, D]  f32   VMEM matmul accumulator
    """
    k = pl.program_id(1)

    @pl.when(k == 0)
    def _():
        acc_scratch[...] = jnp.zeros_like(acc_scratch)

    acc_scratch[...] += jnp.dot(a_ref[...], e_ref[...],
                                preferred_element_type=jnp.float32)

    @pl.when(k == pl.num_programs(1) - 1)
    def _():
        e_new = acc_scratch[...]
        e_out_ref[...] = e_new.astype(e_out_ref.dtype)
        acc_out_ref[...] = acc_in_ref[...] + e_new


def lightgcn_last_layer_kernel(a_ref, e_ref, acc_in_ref, acc_out_ref,
                               acc_scratch, *, inv_layers: float):
    """Final propagation layer: fold E_L into the running sum and apply the 1/(L+1)
    mean scale; skip the unused E_L HBM writeback entirely."""
    k = pl.program_id(1)

    @pl.when(k == 0)
    def _():
        acc_scratch[...] = jnp.zeros_like(acc_scratch)

    acc_scratch[...] += jnp.dot(a_ref[...], e_ref[...],
                                preferred_element_type=jnp.float32)

    @pl.when(k == pl.num_programs(1) - 1)
    def _():
        acc_out_ref[...] = (acc_in_ref[...] + acc_scratch[...]) * inv_layers


def _round_up(x: int, m: int) -> int:
    return (x + m - 1) // m * m


@functools.partial(
    jax.jit,
    static_argnames=("num_users", "num_items", "num_layers", "tm", "tk"))
def lightgcn_forward(adj, ego_emb, num_users, num_items, num_layers, *,
                     tm=512, tk=256):
    """adj: [N, N] f32 normalized adjacency; ego_emb: [N, D] f32.

    Returns (user_embeddings [num_users, D], item_embeddings [num_items, D]).
    """
    N, D = ego_emb.shape
    assert adj.shape == (N, N)
    lcm = tm * tk // math.gcd(tm, tk)
    Np = _round_up(N, lcm)           # pad node dim so both tm and tk divide it
    Dp = _round_up(D, 128)           # lane-dense output (multiple of 128)

    adj_p = jnp.zeros((Np, Np), jnp.bfloat16).at[:N, :N].set(adj.astype(jnp.bfloat16))
    e0 = jnp.zeros((Np, Dp), jnp.float32).at[:N, :D].set(ego_emb.astype(jnp.float32))

    grid = (Np // tm, Np // tk)
    inv_layers = 1.0 / float(num_layers + 1)

    in_specs = [
        pl.BlockSpec((tm, tk), lambda i, k: (i, k)),  # A
        pl.BlockSpec((tk, Dp), lambda i, k: (k, 0)),  # E_{k-1}
        pl.BlockSpec((tm, Dp), lambda i, k: (i, 0)),  # running sum (in)
    ]
    row_spec = pl.BlockSpec((tm, Dp), lambda i, k: (i, 0))
    compiler_params = pltpu.CompilerParams(
        dimension_semantics=("parallel", "arbitrary"))

    mid_layer = pl.pallas_call(
        lightgcn_layer_kernel,
        out_shape=(
            jax.ShapeDtypeStruct((Np, Dp), jnp.bfloat16),   # E_k
            jax.ShapeDtypeStruct((Np, Dp), jnp.float32),    # running sum
        ),
        grid_spec=pltpu.PrefetchScalarGridSpec(
            num_scalar_prefetch=0,
            grid=grid,
            in_specs=in_specs,
            out_specs=(row_spec, row_spec),
            scratch_shapes=[pltpu.VMEM((tm, Dp), jnp.float32)],
        ),
        compiler_params=compiler_params,
        input_output_aliases={2: 1},   # reuse the running-sum HBM buffer
    )

    last_layer = pl.pallas_call(
        functools.partial(lightgcn_last_layer_kernel, inv_layers=inv_layers),
        out_shape=jax.ShapeDtypeStruct((Np, Dp), jnp.float32),  # mean of all layers
        grid_spec=pltpu.PrefetchScalarGridSpec(
            num_scalar_prefetch=0,
            grid=grid,
            in_specs=in_specs,
            out_specs=row_spec,
            scratch_shapes=[pltpu.VMEM((tm, Dp), jnp.float32)],
        ),
        compiler_params=compiler_params,
        input_output_aliases={2: 0},
    )

    e = e0.astype(jnp.bfloat16)      # bf16 operand stream for the MXU
    acc = e0                         # f32 running sum of layers, starts at E0

    if num_layers == 0:
        out = acc[:N, :D]            # mean of a single (ego) layer
    else:
        for _ in range(num_layers - 1):
            e, acc = mid_layer(adj_p, e, acc)
        acc = last_layer(adj_p, e, acc)
        out = acc[:N, :D]

    return out[:num_users], out[num_users:]


def build_normalized_adj(interactions, n_users, n_items):
    """Symmetric-normalized bipartite adjacency D^-1/2 A D^-1/2 (dense)."""
    N = n_users + n_items
    A = jnp.zeros((N, N), jnp.float32)
    A = A.at[:n_users, n_users:].set(interactions)
    A = A.at[n_users:, :n_users].set(interactions.T)
    deg = A.sum(axis=1)
    d_inv_sqrt = jnp.where(deg > 0, 1.0 / jnp.sqrt(deg), 0.0)
    return A * d_inv_sqrt[:, None] * d_inv_sqrt[None, :]


def reference_forward(adj, ego_emb, n_users, n_items, num_layers):
    """Pure-JAX reference mirroring the kernel's bf16-operand / f32-accumulate math."""
    adj_bf = adj.astype(jnp.bfloat16)
    e = ego_emb.astype(jnp.bfloat16)
    acc = ego_emb.astype(jnp.float32)
    for _ in range(num_layers):
        e_new = jnp.dot(adj_bf, e, preferred_element_type=jnp.float32)
        acc = acc + e_new
        e = e_new.astype(jnp.bfloat16)
    out = acc / float(num_layers + 1)
    return out[:n_users], out[n_users:]


def _run_case(key, n_users, n_items, latent_dim, num_layers, tm, tk):
    k_user, k_item, k_inter = jax.random.split(key, 3)
    user_emb = jax.random.normal(k_user, (n_users, latent_dim), jnp.float32)
    item_emb = jax.random.normal(k_item, (n_items, latent_dim), jnp.float32)
    ego_emb = jnp.concatenate([user_emb, item_emb], axis=0)           # [N, D]

    interactions = (jax.random.uniform(k_inter, (n_users, n_items)) < 0.3).astype(
        jnp.float32)
    adj = build_normalized_adj(interactions, n_users, n_items)        # [N, N]

    user_out, item_out = lightgcn_forward(adj, ego_emb, n_users, n_items,
                                          num_layers, tm=tm, tk=tk)
    jax.block_until_ready((user_out, item_out))

    ref_user, ref_item = reference_forward(adj, ego_emb, n_users, n_items, num_layers)
    assert user_out.shape == (n_users, latent_dim)
    assert item_out.shape == (n_items, latent_dim)
    assert jnp.allclose(user_out, ref_user, atol=1e-2, rtol=1e-2)
    assert jnp.allclose(item_out, ref_item, atol=1e-2, rtol=1e-2)


if __name__ == "__main__":
    key = jax.random.PRNGKey(0)
    k1, k2 = jax.random.split(key)

    # Small config consistent with the module (single-tile grid after padding).
    _run_case(k1, n_users=8, n_items=24, latent_dim=128, num_layers=3,
              tm=256, tk=256)

    # Larger, non-aligned config exercising a multi-tile grid, unequal tm/tk,
    # padding, and the K-axis accumulator pattern.
    _run_case(k2, n_users=150, n_items=250, latent_dim=64, num_layers=2,
              tm=256, tk=128)

    print("KERNEL_OK")
</pallas_src>

<mosaic_0001>
module attributes {stable_mosaic.version = 11 : i64} {
  func.func @lightgcn_last_layer_kernel(%arg0: i32, %arg1: i32, %arg2: memref<256x256xbf16, #tpu.memory_space<vmem>>, %arg3: memref<256x128xbf16, #tpu.memory_space<vmem>>, %arg4: memref<256x128xf32, #tpu.memory_space<vmem>>, %arg5: memref<256x128xf32, #tpu.memory_space<vmem>>, %arg6: memref<256x128xf32, #tpu.memory_space<vmem>>) attributes {dimension_semantics = [#tpu.dimension_semantics<parallel>, #tpu.dimension_semantics<arbitrary>], iteration_bounds = array<i64: 1, 1>, scalar_prefetch = 0 : i64, scratch_operands = 1 : i64, tpu.core_type = #tpu.core_type<tc>, window_params = [{transform_indices = @transform_0, window_bounds = array<i64: 256, 256>}, {transform_indices = @transform_1, window_bounds = array<i64: 256, 128>}, {transform_indices = @transform_2, window_bounds = array<i64: 256, 128>}, {transform_indices = @transform_3, window_bounds = array<i64: 256, 128>}]} {
    %c0_i32 = arith.constant 0 : i32
    %0 = arith.cmpi eq, %arg1, %c0_i32 : i32
    %1 = arith.extui %0 : i1 to i32
    %c0_i32_0 = arith.constant 0 : i32
    %2 = arith.cmpi ne, %1, %c0_i32_0 : i32
    scf.if %2 {
      %cst_10 = arith.constant 0.000000e+00 : f32
      %12 = vector.broadcast %cst_10 : f32 to vector<256x128xf32>
      %c0_11 = arith.constant 0 : index
      %c0_12 = arith.constant 0 : index
      %13 = vector.load %arg6[%c0_11, %c0_12] : memref<256x128xf32, #tpu.memory_space<vmem>>, vector<256x128xf32>
      tpu.vector_store %arg6[%c0_11, %c0_12], %12 {strides = array<i32>} : memref<256x128xf32, #tpu.memory_space<vmem>>, vector<256x128xf32>,
    } else {
    }
    %c0 = arith.constant 0 : index
    %c0_1 = arith.constant 0 : index
    %3 = vector.load %arg6[%c0, %c0_1] : memref<256x128xf32, #tpu.memory_space<vmem>>, vector<256x128xf32>
    %c0_2 = arith.constant 0 : index
    %c0_3 = arith.constant 0 : index
    %4 = vector.load %arg2[%c0_2, %c0_3] : memref<256x256xbf16, #tpu.memory_space<vmem>>, vector<256x256xbf16>
    %c0_4 = arith.constant 0 : index
    %c0_5 = arith.constant 0 : index
    %5 = vector.load %arg3[%c0_4, %c0_5] : memref<256x128xbf16, #tpu.memory_space<vmem>>, vector<256x128xbf16>
    %cst = arith.constant dense<0.000000e+00> : vector<256x128xf32>
    %6 = tpu.matmul %4, %5, %cst {dimension_numbers = #tpu.dot_dimension_numbers<[1], [0], [0], [1], [0, 0, 1, 1], [], []>} : vector<256x256xbf16>, vector<256x128xbf16>, vector<256x128xf32> -> vector<256x128xf32>
    %7 = arith.addf %3, %6 : vector<256x128xf32>
    %c0_6 = arith.constant 0 : index
    %c0_7 = arith.constant 0 : index
    %8 = vector.load %arg6[%c0_6, %c0_7] : memref<256x128xf32, #tpu.memory_space<vmem>>, vector<256x128xf32>
    tpu.vector_store %arg6[%c0_6, %c0_7], %7 {strides = array<i32>} : memref<256x128xf32, #tpu.memory_space<vmem>>, vector<256x128xf32>,
    %c0_i32_8 = arith.constant 0 : i32
    %9 = arith.cmpi eq, %arg1, %c0_i32_8 : i32
    %10 = arith.extui %9 : i1 to i32
    %c0_i32_9 = arith.constant 0 : i32
    %11 = arith.cmpi ne, %10, %c0_i32_9 : i32
    scf.if %11 {
      %c0_10 = arith.constant 0 : index
      %c0_11 = arith.constant 0 : index
      %12 = vector.load %arg4[%c0_10, %c0_11] : memref<256x128xf32, #tpu.memory_space<vmem>>, vector<256x128xf32>
      %c0_12 = arith.constant 0 : index
      %c0_13 = arith.constant 0 : index
      %13 = vector.load %arg6[%c0_12, %c0_13] : memref<256x128xf32, #tpu.memory_space<vmem>>, vector<256x128xf32>
      %14 = arith.addf %12, %13 : vector<256x128xf32>
      %cst_14 = arith.constant 2.500000e-01 : f32
      %15 = vector.broadcast %cst_14 : f32 to vector<256x128xf32>
      %16 = arith.mulf %14, %15 : vector<256x128xf32>
      %c0_15 = arith.constant 0 : index
      %c0_16 = arith.constant 0 : index
      %17 = vector.load %arg5[%c0_15, %c0_16] : memref<256x128xf32, #tpu.memory_space<vmem>>, vector<256x128xf32>
      tpu.vector_store %arg5[%c0_15, %c0_16], %16 {strides = array<i32>} : memref<256x128xf32, #tpu.memory_space<vmem>>, vector<256x128xf32>,
    } else {
    }
    return
  }
  func.func @transform_0(%arg0: i32, %arg1: i32) -> (i32, i32) {
    %c0_i32 = arith.constant 0 : i32
    return %arg0, %arg1 : i32, i32
  }
  func.func @transform_1(%arg0: i32, %arg1: i32) -> (i32, i32) {
    %c0_i32 = arith.constant 0 : i32
    %c0_i32_0 = arith.constant 0 : i32
    return %arg1, %c0_i32 : i32, i32
  }
  func.func @transform_2(%arg0: i32, %arg1: i32) -> (i32, i32) {
    %c0_i32 = arith.constant 0 : i32
    %c0_i32_0 = arith.constant 0 : i32
    return %arg0, %c0_i32 : i32, i32
  }
  func.func @transform_3(%arg0: i32, %arg1: i32) -> (i32, i32) {
    %c0_i32 = arith.constant 0 : i32
    %c0_i32_0 = arith.constant 0 : i32
    return %arg0, %c0_i32 : i32, i32
  }
}

module attributes {stable_mosaic.version = 11 : i64} {
  func.func @lightgcn_layer_kernel(%arg0: i32, %arg1: i32, %arg2: memref<256x256xbf16, #tpu.memory_space<vmem>>, %arg3: memref<256x128xbf16, #tpu.memory_space<vmem>>, %arg4: memref<256x128xf32, #tpu.memory_space<vmem>>, %arg5: memref<256x128xbf16, #tpu.memory_space<vmem>>, %arg6: memref<256x128xf32, #tpu.memory_space<vmem>>, %arg7: memref<256x128xf32, #tpu.memory_space<vmem>>) attributes {dimension_semantics = [#tpu.dimension_semantics<parallel>, #tpu.dimension_semantics<arbitrary>], iteration_bounds = array<i64: 1, 1>, scalar_prefetch = 0 : i64, scratch_operands = 1 : i64, tpu.core_type = #tpu.core_type<tc>, window_params = [{transform_indices = @transform_0, window_bounds = array<i64: 256, 256>}, {transform_indices = @transform_1, window_bounds = array<i64: 256, 128>}, {transform_indices = @transform_2, window_bounds = array<i64: 256, 128>}, {transform_indices = @transform_3, window_bounds = array<i64: 256, 128>}, {transform_indices = @transform_4, window_bounds = array<i64: 256, 128>}]} {
    %c0_i32 = arith.constant 0 : i32
    %0 = arith.cmpi eq, %arg1, %c0_i32 : i32
    %1 = arith.extui %0 : i1 to i32
    %c0_i32_0 = arith.constant 0 : i32
    %2 = arith.cmpi ne, %1, %c0_i32_0 : i32
    scf.if %2 {
      %cst_10 = arith.constant 0.000000e+00 : f32
      %12 = vector.broadcast %cst_10 : f32 to vector<256x128xf32>
      %c0_11 = arith.constant 0 : index
      %c0_12 = arith.constant 0 : index
      %13 = vector.load %arg7[%c0_11, %c0_12] : memref<256x128xf32, #tpu.memory_space<vmem>>, vector<256x128xf32>
      tpu.vector_store %arg7[%c0_11, %c0_12], %12 {strides = array<i32>} : memref<256x128xf32, #tpu.memory_space<vmem>>, vector<256x128xf32>,
    } else {
    }
    %c0 = arith.constant 0 : index
    %c0_1 = arith.constant 0 : index
    %3 = vector.load %arg7[%c0, %c0_1] : memref<256x128xf32, #tpu.memory_space<vmem>>, vector<256x128xf32>
    %c0_2 = arith.constant 0 : index
    %c0_3 = arith.constant 0 : index
    %4 = vector.load %arg2[%c0_2, %c0_3] : memref<256x256xbf16, #tpu.memory_space<vmem>>, vector<256x256xbf16>
    %c0_4 = arith.constant 0 : index
    %c0_5 = arith.constant 0 : index
    %5 = vector.load %arg3[%c0_4, %c0_5] : memref<256x128xbf16, #tpu.memory_space<vmem>>, vector<256x128xbf16>
    %cst = arith.constant dense<0.000000e+00> : vector<256x128xf32>
    %6 = tpu.matmul %4, %5, %cst {dimension_numbers = #tpu.dot_dimension_numbers<[1], [0], [0], [1], [0, 0, 1, 1], [], []>} : vector<256x256xbf16>, vector<256x128xbf16>, vector<256x128xf32> -> vector<256x128xf32>
    %7 = arith.addf %3, %6 : vector<256x128xf32>
    %c0_6 = arith.constant 0 : index
    %c0_7 = arith.constant 0 : index
    %8 = vector.load %arg7[%c0_6, %c0_7] : memref<256x128xf32, #tpu.memory_space<vmem>>, vector<256x128xf32>
    tpu.vector_store %arg7[%c0_6, %c0_7], %7 {strides = array<i32>} : memref<256x128xf32, #tpu.memory_space<vmem>>, vector<256x128xf32>,
    %c0_i32_8 = arith.constant 0 : i32
    %9 = arith.cmpi eq, %arg1, %c0_i32_8 : i32
    %10 = arith.extui %9 : i1 to i32
    %c0_i32_9 = arith.constant 0 : i32
    %11 = arith.cmpi ne, %10, %c0_i32_9 : i32
    scf.if %11 {
      %c0_10 = arith.constant 0 : index
      %c0_11 = arith.constant 0 : index
      %12 = vector.load %arg7[%c0_10, %c0_11] : memref<256x128xf32, #tpu.memory_space<vmem>>, vector<256x128xf32>
      %13 = arith.truncf %12 : vector<256x128xf32> to vector<256x128xbf16>
      %c0_12 = arith.constant 0 : index
      %c0_13 = arith.constant 0 : index
      %14 = vector.load %arg5[%c0_12, %c0_13] : memref<256x128xbf16, #tpu.memory_space<vmem>>, vector<256x128xbf16>
      tpu.vector_store %arg5[%c0_12, %c0_13], %13 {strides = array<i32>} : memref<256x128xbf16, #tpu.memory_space<vmem>>, vector<256x128xbf16>,
      %c0_14 = arith.constant 0 : index
      %c0_15 = arith.constant 0 : index
      %15 = vector.load %arg4[%c0_14, %c0_15] : memref<256x128xf32, #tpu.memory_space<vmem>>, vector<256x128xf32>
      %16 = arith.addf %15, %12 : vector<256x128xf32>
      %c0_16 = arith.constant 0 : index
      %c0_17 = arith.constant 0 : index
      %17 = vector.load %arg6[%c0_16, %c0_17] : memref<256x128xf32, #tpu.memory_space<vmem>>, vector<256x128xf32>
      tpu.vector_store %arg6[%c0_16, %c0_17], %16 {strides = array<i32>} : memref<256x128xf32, #tpu.memory_space<vmem>>, vector<256x128xf32>,
    } else {
    }
    return
  }
  func.func @transform_0(%arg0: i32, %arg1: i32) -> (i32, i32) {
    %c0_i32 = arith.constant 0 : i32
    return %arg0, %arg1 : i32, i32
  }
  func.func @transform_1(%arg0: i32, %arg1: i32) -> (i32, i32) {
    %c0_i32 = arith.constant 0 : i32
    %c0_i32_0 = arith.constant 0 : i32
    return %arg1, %c0_i32 : i32, i32
  }
  func.func @transform_2(%arg0: i32, %arg1: i32) -> (i32, i32) {
    %c0_i32 = arith.constant 0 : i32
    %c0_i32_0 = arith.constant 0 : i32
    return %arg0, %c0_i32 : i32, i32
  }
  func.func @transform_3(%arg0: i32, %arg1: i32) -> (i32, i32) {
    %c0_i32 = arith.constant 0 : i32
    %c0_i32_0 = arith.constant 0 : i32
    return %arg0, %c0_i32 : i32, i32
  }
  func.func @transform_4(%arg0: i32, %arg1: i32) -> (i32, i32) {
    %c0_i32 = arith.constant 0 : i32
    %c0_i32_0 = arith.constant 0 : i32
    return %arg0, %c0_i32 : i32, i32
  }
}

</mosaic_0001>

<bundles_post_ra>
// kernel: lightgcn_forward.5
= control target key start
LH: loop header
LB: loop body
LE: loop exit
PB: predicated region body
PF: predicated region fallthrough
CT: control target
= control target key end

     0   :  { %s1391_s1 = inlined_call_operand.vmem [shape: bf16[256,128], index: 1, kind: input, shape index: {}]   ;;  %s1392_s0 = inlined_call_operand.vmem [shape: bf16[256,256], index: 0, kind: input, shape index: {}]   ;;  %s1393_s2 = inlined_call_operand.vmem [shape: f32[256,128], index: 2, kind: input, shape index: {}, may-alias: {2,3}]   ;;  %s1394_s3 = inlined_call_operand.vmem [shape: f32[256,128], index: 3, kind: output, shape index: {}, may-alias: {2,3}]  }
   0x1   :  { %v971_v0 = vld [vmem:[%s1391_s1 + $0x40] sm:$0xff]   ;;  %v973_v2 = vld [vmem:[%s1391_s1 + $0x48] sm:$0xff]   ;;  %v975_v4 = vld [vmem:[%s1391_s1 + $0x50] sm:$0xff]  }
   0x2   :  { %v972_v1 = vld [vmem:[%s1391_s1] sm:$0xff]   ;;  %843 = vmatprep.subr.bf16.mxu0 %v971_v0  ;;  %955 = vmatprep.subr.bf16.mxu1 %v971_v0  ;;  %v974_v3 = vld [vmem:[%s1391_s1 + $0x8] sm:$0xff]   ;;  %v976_v5 = vld [vmem:[%s1391_s1 + $0x10] sm:$0xff]  }
   0x3   :  { %844 = vmatpush3.bf16.msra.mxu0 %v972_v1  ;;  %963 = vmatpush3.bf16.msra.mxu1 %v972_v1  ;;  %v977_v6 = vld [vmem:[%s1391_s1 + $0x58] sm:$0xff]   ;;  %v979_v8 = vld [vmem:[%s1391_s1 + $0x60] sm:$0xff]   ;;  %v981_v10 = vld [vmem:[%s1391_s1 + $0x68] sm:$0xff]  }
   0x4   :  { %845 = vmatprep.subr.bf16.mxu0 %v973_v2  ;;  %956 = vmatprep.subr.bf16.mxu1 %v973_v2  ;;  %v978_v7 = vld [vmem:[%s1391_s1 + $0x18] sm:$0xff]   ;;  %v980_v9 = vld [vmem:[%s1391_s1 + $0x20] sm:$0xff]   ;;  %v982_v13 = vld [vmem:[%s1391_s1 + $0x28] sm:$0xff]  }
   0x5   :  { %v989_v11 = vld [vmem:[%s1392_s0 + $0x4] ss:$8 sps:$4 sm:$0xff]   ;;  %v983_v14 = vld [vmem:[%s1391_s1 + $0x70] sm:$0xff]   ;;  %v985_v16 = vld [vmem:[%s1391_s1 + $0x78] sm:$0xff]  }
   0x6   :  { %v992_v12 = vld [vmem:[%s1392_s0 + $0x84] ss:$8 sps:$4 sm:$0xff]   ;;  %435 = vmatprep.mubr.bf16.mxu0 %v989_v11  ;;  %v984_v15 = vld [vmem:[%s1391_s1 + $0x30] sm:$0xff]   ;;  %v986_v17 = vld [vmem:[%s1391_s1 + $0x38] sm:$0xff]  }
   0x7   :  { %846 = vmatpush3.bf16.msra.mxu0 %v974_v3  ;;  %964 = vmatpush3.bf16.msra.mxu1 %v974_v3  ;;  %v987_v18 = vld [vmem:[%s1392_s0] ss:$8 sps:$4 sm:$0xff]   ;;  %v993_v20 = vld [vmem:[%s1392_s0 + $0x14] ss:$8 sps:$4 sm:$0xff]   ;;  %v997_v22 = vld [vmem:[%s1392_s0 + $0x10] ss:$8 sps:$4 sm:$0xff]  }
   0x8   :  { %847 = vmatprep.subr.bf16.mxu0 %v975_v4  ;;  %957 = vmatprep.subr.bf16.mxu1 %v975_v4  ;;  %v990_v19 = vld [vmem:[%s1392_s0 + $0x80] ss:$8 sps:$4 sm:$0xff]   ;;  %v995_v21 = vld [vmem:[%s1392_s0 + $0x94] ss:$8 sps:$4 sm:$0xff]   ;;  %v998_v23 = vld [vmem:[%s1392_s0 + $0x90] ss:$8 sps:$4 sm:$0xff]  }
   0x9   :  { %499 = vmatprep.mubr.bf16.mxu1 %v992_v12  ;;  %v999_v24 = vld [vmem:[%s1392_s0 + $0x24] ss:$8 sps:$4 sm:$0xff]   ;;  %v1003_v26 = vld [vmem:[%s1392_s0 + $0x20] ss:$8 sps:$4 sm:$0xff]   ;;  %v1005_v28 = vld [vmem:[%s1392_s0 + $0x34] ss:$8 sps:$4 sm:$0xff]  }
   0xa   :  { %v1001_v25 = vld [vmem:[%s1392_s0 + $0xa4] ss:$8 sps:$4 sm:$0xff]   ;;  %v1004_v27 = vld [vmem:[%s1392_s0 + $0xa0] ss:$8 sps:$4 sm:$0xff]   ;;  %v1007_v29 = vld [vmem:[%s1392_s0 + $0xb4] ss:$8 sps:$4 sm:$0xff]  }
   0xb   :  { %848 = vmatpush3.bf16.msra.mxu0 %v976_v5  ;;  %965 = vmatpush3.bf16.msra.mxu1 %v976_v5  ;;  %v1009_v30 = vld [vmem:[%s1392_s0 + $0x30] ss:$8 sps:$4 sm:$0xff]   ;;  %v1011_v32 = vld [vmem:[%s1392_s0 + $0x44] ss:$8 sps:$4 sm:$0xff]   ;;  %v1015_v34 = vld [vmem:[%s1392_s0 + $0x40] ss:$8 sps:$4 sm:$0xff]  }
   0xc   :  { %849 = vmatprep.subr.bf16.mxu0 %v977_v6  ;;  %958 = vmatprep.subr.bf16.mxu1 %v977_v6  ;;  %v1010_v31 = vld [vmem:[%s1392_s0 + $0xb0] ss:$8 sps:$4 sm:$0xff]   ;;  %v1013_v33 = vld [vmem:[%s1392_s0 + $0xc4] ss:$8 sps:$4 sm:$0xff]   ;;  %v1016_v35 = vld [vmem:[%s1392_s0 + $0xc0] ss:$8 sps:$4 sm:$0xff]  }
   0xd   :  { %v1017_v36 = vld [vmem:[%s1392_s0 + $0x54] ss:$8 sps:$4 sm:$0xff]   ;;  %v1021_v38 = vld [vmem:[%s1392_s0 + $0x50] ss:$8 sps:$4 sm:$0xff]   ;;  %v1023_v40 = vld [vmem:[%s1392_s0 + $0x64] ss:$8 sps:$4 sm:$0xff]  }
   0xe   :  { %v1019_v37 = vld [vmem:[%s1392_s0 + $0xd4] ss:$8 sps:$4 sm:$0xff]   ;;  %v1022_v39 = vld [vmem:[%s1392_s0 + $0xd0] ss:$8 sps:$4 sm:$0xff]   ;;  %v1025_v41 = vld [vmem:[%s1392_s0 + $0xe4] ss:$8 sps:$4 sm:$0xff]  }
   0xf   :  { %850 = vmatpush3.bf16.msra.mxu0 %v978_v7  ;;  %966 = vmatpush3.bf16.msra.mxu1 %v978_v7  ;;  %v1027_v42 = vld [vmem:[%s1392_s0 + $0x60] ss:$8 sps:$4 sm:$0xff]   ;;  %v1029_v44 = vld [vmem:[%s1392_s0 + $0x74] ss:$8 sps:$4 sm:$0xff]   ;;  %v1033_v46 = vld [vmem:[%s1392_s0 + $0x70] ss:$8 sps:$4 sm:$0xff]  }
  0x10   :  { %851 = vmatprep.subr.bf16.mxu0 %v979_v8  ;;  %959 = vmatprep.subr.bf16.mxu1 %v979_v8  ;;  %v1028_v43 = vld [vmem:[%s1392_s0 + $0xe0] ss:$8 sps:$4 sm:$0xff]   ;;  %v1031_v45 = vld [vmem:[%s1392_s0 + $0xf4] ss:$8 sps:$4 sm:$0xff]   ;;  %v1034_v47 = vld [vmem:[%s1392_s0 + $0xf0] ss:$8 sps:$4 sm:$0xff]  }
  0x11   :  { %v631_v51 = vld [vmem:[%s1393_s2] sm:$0xff]  ;;  %v632_v59 = vld [vmem:[%s1393_s2 + $0x8] sm:$0xff] }
  0x12   :  { %v647_v53 = vld [vmem:[%s1393_s2 + $0x80] sm:$0xff]  ;;  %v648_v61 = vld [vmem:[%s1393_s2 + $0x88] sm:$0xff] }
  0x13   :  { %852 = vmatpush3.bf16.msra.mxu0 %v980_v9  ;;  %967 = vmatpush3.bf16.msra.mxu1 %v980_v9 }
  0x14   :  { %853 = vmatprep.subr.bf16.mxu0 %v981_v10  ;;  %960 = vmatprep.subr.bf16.mxu1 %v981_v10 }
  0x17   :  { %854 = vmatpush3.bf16.msra.mxu0 %v982_v13  ;;  %968 = vmatpush3.bf16.msra.mxu1 %v982_v13 }
  0x18   :  { %855 = vmatprep.subr.bf16.mxu0 %v983_v14  ;;  %961 = vmatprep.subr.bf16.mxu1 %v983_v14 }
  0x1b   :  { %856 = vmatpush3.bf16.msra.mxu0 %v984_v15  ;;  %969 = vmatpush3.bf16.msra.mxu1 %v984_v15 }
  0x1c   :  { %857 = vmatprep.subr.bf16.mxu0 %v985_v16  ;;  %962 = vmatprep.subr.bf16.mxu1 %v985_v16 }
  0x1f   :  { %858 = vmatpush3.bf16.msra.mxu0 %v986_v17  ;;  %970 = vmatpush3.bf16.msra.mxu1 %v986_v17 }
  0x22   :  { %436 = vmatmul.mubr.bf16.vlgmr.msra.gmra.mrb[0].mxu0 %v987_v18  ;;  %500 = vmatmul.mubr.bf16.vlgmr.msra.gmra.mrb[0].mxu1 %v990_v19 }
  0x23   :  { %443 = vmatprep.mubr.bf16.mxu0 %v993_v20  ;;  %507 = vmatprep.mubr.bf16.mxu1 %v995_v21 }
  0x2a   :  { %444 = vmatmul.mubr.bf16.gmra.mrb[4].mxu0 %v997_v22  ;;  %508 = vmatmul.mubr.bf16.gmra.mrb[4].mxu1 %v998_v23 }
  0x2b   :  { %451 = vmatprep.mubr.bf16.mxu0 %v999_v24  ;;  %515 = vmatprep.mubr.bf16.mxu1 %v1001_v25 }
  0x32   :  { %452 = vmatmul.mubr.bf16.gmra.mrb[8].mxu0 %v1003_v26  ;;  %516 = vmatmul.mubr.bf16.gmra.mrb[8].mxu1 %v1004_v27 }
  0x33   :  { %459 = vmatprep.mubr.bf16.mxu0 %v1005_v28  ;;  %523 = vmatprep.mubr.bf16.mxu1 %v1007_v29 }
  0x3a   :  { %460 = vmatmul.mubr.bf16.gmra.mrb[12].mxu0 %v1009_v30  ;;  %524 = vmatmul.mubr.bf16.gmra.mrb[12].mxu1 %v1010_v31 }
  0x3b   :  { %467 = vmatprep.mubr.bf16.mxu0 %v1011_v32  ;;  %531 = vmatprep.mubr.bf16.mxu1 %v1013_v33 }
  0x42   :  { %468 = vmatmul.mubr.bf16.gmra.mrb[16].mxu0 %v1015_v34  ;;  %532 = vmatmul.mubr.bf16.gmra.mrb[16].mxu1 %v1016_v35 }
  0x43   :  { %475 = vmatprep.mubr.bf16.mxu0 %v1017_v36  ;;  %539 = vmatprep.mubr.bf16.mxu1 %v1019_v37 }
  0x4a   :  { %476 = vmatmul.mubr.bf16.gmra.mrb[20].mxu0 %v1021_v38  ;;  %540 = vmatmul.mubr.bf16.gmra.mrb[20].mxu1 %v1022_v39 }
  0x4b   :  { %483 = vmatprep.mubr.bf16.mxu0 %v1023_v40  ;;  %547 = vmatprep.mubr.bf16.mxu1 %v1025_v41 }
  0x52   :  { %484 = vmatmul.mubr.bf16.gmra.mrb[24].mxu0 %v1027_v42  ;;  %548 = vmatmul.mubr.bf16.gmra.mrb[24].mxu1 %v1028_v43 }
  0x53   :  { %491 = vmatprep.mubr.bf16.mxu0 %v1029_v44  ;;  %555 = vmatprep.mubr.bf16.mxu1 %v1031_v45 }
  0x5a   :  { %492 = vmatmul.mubr.bf16.gmra.mrb[28].mxu0 %v1033_v46  ;;  %556 = vmatmul.mubr.bf16.gmra.mrb[28].mxu1 %v1034_v47 }
  0xf5   :  { %v859_v48 = vpop.f32.mrb[0].mxu0  ;;  %v907_v49 = vpop.f32.mrb[0].mxu1 }
  0xf6   :  { %v860_v50 = vpop.f32.mrb[1].mxu0  ;;  %v908_v52 = vpop.f32.mrb[1].mxu1 }
  0xf7   :  { %v861_v54 = vadd.f32 %v860_v50, %v859_v48  ;;  %v909_v55 = vadd.f32 %v908_v52, %v907_v49  ;;  %v862_v56 = vpop.f32.mrb[2].mxu0  ;;  %v910_v57 = vpop.f32.mrb[2].mxu1 }
  0xf8   :  { %v863_v58 = vpop.f32.mrb[3].mxu0  ;;  %v911_v60 = vpop.f32.mrb[3].mxu1 }
  0xf9   :  { %v695_v62 = vadd.f32 %v861_v54, %v631_v51  ;;  %v711_v63 = vadd.f32 %v909_v55, %v647_v53  ;;  %v864_v0 = vadd.f32 %v863_v58, %v862_v56  ;;  %v912_v1 = vadd.f32 %v911_v60, %v910_v57 }
  0xfb   :  { %v727_v2 = vmul.f32 0.25, %v695_v62  ;;  %v743_v3 = vmul.f32 0.25, %v711_v63  ;;  %v696_v4 = vadd.f32 %v864_v0, %v632_v59  ;;  %v712_v5 = vadd.f32 %v912_v1, %v648_v61 }
  0xfd   :  { %759 = vst [vmem:[%s1394_s3] sm:$0xff] %v727_v2  ;;  %775 = vst [vmem:[%s1394_s3 + $0x80] sm:$0xff] %v743_v3  ;;  %v728_v6 = vmul.f32 0.25, %v696_v4  ;;  %v744_v7 = vmul.f32 0.25, %v712_v5  ;;  %v865_v8 = vpop.f32.mrb[4].mxu0  ;;  %v913_v9 = vpop.f32.mrb[4].mxu1 }
  0xfe   :  { %v866_v10 = vpop.f32.mrb[5].mxu0  ;;  %v914_v12 = vpop.f32.mrb[5].mxu1 }
  0xff   :  { %v867_v14 = vadd.f32 %v866_v10, %v865_v8  ;;  %v915_v15 = vadd.f32 %v914_v12, %v913_v9  ;;  %v868_v16 = vpop.f32.mrb[6].mxu0  ;;  %v916_v17 = vpop.f32.mrb[6].mxu1 }
 0x100   :  { %v869_v18 = vpop.f32.mrb[7].mxu0  ;;  %v917_v20 = vpop.f32.mrb[7].mxu1 }
 0x101   :  { %v870_v24 = vadd.f32 %v869_v18, %v868_v16  ;;  %v918_v25 = vadd.f32 %v917_v20, %v916_v17 }
 0x104   :  { %v633_v11 = vld [vmem:[%s1393_s2 + $0x10] sm:$0xff] }
 0x105   :  { %v649_v13 = vld [vmem:[%s1393_s2 + $0x90] sm:$0xff]  ;;  %v697_v22 = vadd.f32 %v867_v14, %v633_v11  ;;  %v871_v32 = vpop.f32.mrb[8].mxu0  ;;  %v919_v33 = vpop.f32.mrb[8].mxu1 }
 0x106   :  { %760 = vst [vmem:[%s1394_s3 + $0x8] sm:$0xff] %v728_v6  ;;  %776 = vst [vmem:[%s1394_s3 + $0x88] sm:$0xff] %v744_v7  ;;  %v713_v23 = vadd.f32 %v915_v15, %v649_v13  ;;  %v872_v34 = vpop.f32.mrb[9].mxu0  ;;  %v920_v36 = vpop.f32.mrb[9].mxu1 }
 0x107   :  { %v729_v26 = vmul.f32 0.25, %v697_v22  ;;  %v873_v38 = vadd.f32 %v872_v34, %v871_v32  ;;  %v921_v39 = vadd.f32 %v920_v36, %v919_v33  ;;  %v874_v40 = vpop.f32.mrb[10].mxu0  ;;  %v922_v41 = vpop.f32.mrb[10].mxu1 }
 0x108   :  { %v745_v27 = vmul.f32 0.25, %v713_v23  ;;  %v875_v42 = vpop.f32.mrb[11].mxu0  ;;  %v923_v44 = vpop.f32.mrb[11].mxu1 }
 0x109   :  { %v876_v48 = vadd.f32 %v875_v42, %v874_v40  ;;  %v924_v49 = vadd.f32 %v923_v44, %v922_v41 }
 0x10d   :  { %v634_v19 = vld [vmem:[%s1393_s2 + $0x18] sm:$0xff]  ;;  %v877_v56 = vpop.f32.mrb[12].mxu0  ;;  %v925_v57 = vpop.f32.mrb[12].mxu1 }
 0x10e   :  { %v650_v21 = vld [vmem:[%s1393_s2 + $0x98] sm:$0xff]  ;;  %v698_v28 = vadd.f32 %v870_v24, %v634_v19  ;;  %v878_v58 = vpop.f32.mrb[13].mxu0  ;;  %v926_v60 = vpop.f32.mrb[13].mxu1 }
 0x10f   :  { %v714_v29 = vadd.f32 %v918_v25, %v650_v21  ;;  %761 = vst [vmem:[%s1394_s3 + $0x10] sm:$0xff] %v729_v26  ;;  %777 = vst [vmem:[%s1394_s3 + $0x90] sm:$0xff] %v745_v27  ;;  %v879_v62 = vadd.f32 %v878_v58, %v877_v56  ;;  %v927_v63 = vadd.f32 %v926_v60, %v925_v57  ;;  %v880_v0 = vpop.f32.mrb[14].mxu0  ;;  %v928_v1 = vpop.f32.mrb[14].mxu1 }
 0x110   :  { %v730_v30 = vmul.f32 0.25, %v698_v28  ;;  %v881_v2 = vpop.f32.mrb[15].mxu0  ;;  %v929_v4 = vpop.f32.mrb[15].mxu1 }
 0x111   :  { %v746_v31 = vmul.f32 0.25, %v714_v29  ;;  %v882_v8 = vadd.f32 %v881_v2, %v880_v0  ;;  %v930_v9 = vadd.f32 %v929_v4, %v928_v1 }
 0x115   :  { %v883_v16 = vpop.f32.mrb[16].mxu0  ;;  %v931_v17 = vpop.f32.mrb[16].mxu1 }
 0x116   :  { %v635_v35 = vld [vmem:[%s1393_s2 + $0x20] sm:$0xff]  ;;  %v884_v18 = vpop.f32.mrb[17].mxu0  ;;  %v932_v20 = vpop.f32.mrb[17].mxu1 }
 0x117   :  { %v651_v37 = vld [vmem:[%s1393_s2 + $0xa0] sm:$0xff]  ;;  %v699_v46 = vadd.f32 %v873_v38, %v635_v35  ;;  %v885_v22 = vadd.f32 %v884_v18, %v883_v16  ;;  %v933_v23 = vadd.f32 %v932_v20, %v931_v17  ;;  %v886_v24 = vpop.f32.mrb[18].mxu0  ;;  %v934_v25 = vpop.f32.mrb[18].mxu1 }
 0x118   :  { %762 = vst [vmem:[%s1394_s3 + $0x18] sm:$0xff] %v730_v30  ;;  %778 = vst [vmem:[%s1394_s3 + $0x98] sm:$0xff] %v746_v31  ;;  %v715_v47 = vadd.f32 %v921_v39, %v651_v37  ;;  %v887_v26 = vpop.f32.mrb[19].mxu0  ;;  %v935_v28 = vpop.f32.mrb[19].mxu1 }
 0x119   :  { %v731_v50 = vmul.f32 0.25, %v699_v46  ;;  %v888_v32 = vadd.f32 %v887_v26, %v886_v24  ;;  %v936_v33 = vadd.f32 %v935_v28, %v934_v25 }
 0x11a   :  { %v747_v51 = vmul.f32 0.25, %v715_v47 }
 0x11d   :  { %v889_v40 = vpop.f32.mrb[20].mxu0  ;;  %v937_v41 = vpop.f32.mrb[20].mxu1 }
 0x11e   :  { %v890_v42 = vpop.f32.mrb[21].mxu0  ;;  %v938_v44 = vpop.f32.mrb[21].mxu1 }
 0x11f   :  { %v636_v43 = vld [vmem:[%s1393_s2 + $0x28] sm:$0xff]  ;;  %v891_v46 = vadd.f32 %v890_v42, %v889_v40  ;;  %v939_v47 = vadd.f32 %v938_v44, %v937_v41 }
 0x120   :  { %v652_v45 = vld [vmem:[%s1393_s2 + $0xa8] sm:$0xff]  ;;  %v700_v52 = vadd.f32 %v876_v48, %v636_v43  ;;  %v892_v48 = vpop.f32.mrb[22].mxu0 }
 0x121   :  { %v716_v53 = vadd.f32 %v924_v49, %v652_v45  ;;  %763 = vst [vmem:[%s1394_s3 + $0x20] sm:$0xff] %v731_v50  ;;  %779 = vst [vmem:[%s1394_s3 + $0xa0] sm:$0xff] %v747_v51  ;;  %v940_v49 = vpop.f32.mrb[22].mxu1  ;;  %v893_v50 = vpop.f32.mrb[23].mxu0 }
 0x122   :  { %v732_v54 = vmul.f32 0.25, %v700_v52  ;;  %v941_v52 = vpop.f32.mrb[23].mxu1  ;;  %v894_v56 = vadd.f32 %v893_v50, %v892_v48 }
 0x123   :  { %v748_v55 = vmul.f32 0.25, %v716_v53  ;;  %v942_v57 = vadd.f32 %v941_v52, %v940_v49 }
 0x125   :  { %v895_v0 = vpop.f32.mrb[24].mxu0  ;;  %v943_v1 = vpop.f32.mrb[24].mxu1 }
 0x126   :  { %v896_v2 = vpop.f32.mrb[25].mxu0  ;;  %v944_v4 = vpop.f32.mrb[25].mxu1 }
 0x128   :  { %v637_v59 = vld [vmem:[%s1393_s2 + $0x30] sm:$0xff] }
 0x129   :  { %v653_v61 = vld [vmem:[%s1393_s2 + $0xb0] sm:$0xff]  ;;  %v701_v6 = vadd.f32 %v879_v62, %v637_v59 }
 0x12a   :  { %764 = vst [vmem:[%s1394_s3 + $0x28] sm:$0xff] %v732_v54  ;;  %780 = vst [vmem:[%s1394_s3 + $0xa8] sm:$0xff] %v748_v55  ;;  %v717_v7 = vadd.f32 %v927_v63, %v653_v61 }
 0x12b   :  { %v733_v10 = vmul.f32 0.25, %v701_v6  ;;  %v897_v6 = vadd.f32 %v896_v2, %v895_v0 }
 0x12c   :  { %v749_v11 = vmul.f32 0.25, %v717_v7  ;;  %v945_v7 = vadd.f32 %v944_v4, %v943_v1 }
 0x131   :  { %v638_v3 = vld [vmem:[%s1393_s2 + $0x38] sm:$0xff] }
 0x132   :  { %v654_v5 = vld [vmem:[%s1393_s2 + $0xb8] sm:$0xff]  ;;  %v702_v12 = vadd.f32 %v882_v8, %v638_v3  ;;  %v898_v8 = vpop.f32.mrb[26].mxu0 }
 0x133   :  { %v718_v13 = vadd.f32 %v930_v9, %v654_v5  ;;  %765 = vst [vmem:[%s1394_s3 + $0x30] sm:$0xff] %v733_v10  ;;  %781 = vst [vmem:[%s1394_s3 + $0xb0] sm:$0xff] %v749_v11  ;;  %v946_v9 = vpop.f32.mrb[26].mxu1  ;;  %v899_v10 = vpop.f32.mrb[27].mxu0 }
 0x134   :  { %v734_v14 = vmul.f32 0.25, %v702_v12  ;;  %v947_v12 = vpop.f32.mrb[27].mxu1  ;;  %v900_v16 = vadd.f32 %v899_v10, %v898_v8  ;;  %v901_v24 = vpop.f32.mrb[28].mxu0 }
 0x135   :  { %v750_v15 = vmul.f32 0.25, %v718_v13  ;;  %v948_v17 = vadd.f32 %v947_v12, %v946_v9  ;;  %v949_v25 = vpop.f32.mrb[28].mxu1  ;;  %v902_v26 = vpop.f32.mrb[29].mxu0 }
 0x136   :  { %v950_v28 = vpop.f32.mrb[29].mxu1 }
 0x13a   :  { %v639_v19 = vld [vmem:[%s1393_s2 + $0x40] sm:$0xff] }
 0x13b   :  { %v655_v21 = vld [vmem:[%s1393_s2 + $0xc0] sm:$0xff]  ;;  %v703_v30 = vadd.f32 %v885_v22, %v639_v19 }
 0x13c   :  { %766 = vst [vmem:[%s1394_s3 + $0x38] sm:$0xff] %v734_v14  ;;  %782 = vst [vmem:[%s1394_s3 + $0xb8] sm:$0xff] %v750_v15  ;;  %v719_v31 = vadd.f32 %v933_v23, %v655_v21 }
 0x13d   :  { %v735_v34 = vmul.f32 0.25, %v703_v30  ;;  %v903_v30 = vadd.f32 %v902_v26, %v901_v24 }
 0x13e   :  { %v751_v35 = vmul.f32 0.25, %v719_v31  ;;  %v951_v31 = vadd.f32 %v950_v28, %v949_v25 }
 0x143   :  { %v640_v27 = vld [vmem:[%s1393_s2 + $0x48] sm:$0xff] }
 0x144   :  { %v656_v29 = vld [vmem:[%s1393_s2 + $0xc8] sm:$0xff]  ;;  %v704_v36 = vadd.f32 %v888_v32, %v640_v27  ;;  %v904_v32 = vpop.f32.mrb[30].mxu0 }
 0x145   :  { %v720_v37 = vadd.f32 %v936_v33, %v656_v29  ;;  %767 = vst [vmem:[%s1394_s3 + $0x40] sm:$0xff] %v735_v34  ;;  %783 = vst [vmem:[%s1394_s3 + $0xc0] sm:$0xff] %v751_v35  ;;  %v952_v33 = vpop.f32.mrb[30].mxu1  ;;  %v905_v34 = vpop.f32.mrb[31].mxu0 }
 0x146   :  { %v736_v38 = vmul.f32 0.25, %v704_v36  ;;  %v953_v36 = vpop.f32.mrb[31].mxu1  ;;  %v906_v40 = vadd.f32 %v905_v34, %v904_v32 }
 0x147   :  { %v752_v39 = vmul.f32 0.25, %v720_v37  ;;  %v954_v41 = vadd.f32 %v953_v36, %v952_v33 }
 0x14c   :  { %v641_v43 = vld [vmem:[%s1393_s2 + $0x50] sm:$0xff] }
 0x14d   :  { %v657_v45 = vld [vmem:[%s1393_s2 + $0xd0] sm:$0xff]  ;;  %v705_v54 = vadd.f32 %v891_v46, %v641_v43 }
 0x14e   :  { %768 = vst [vmem:[%s1394_s3 + $0x48] sm:$0xff] %v736_v38  ;;  %784 = vst [vmem:[%s1394_s3 + $0xc8] sm:$0xff] %v752_v39  ;;  %v721_v55 = vadd.f32 %v939_v47, %v657_v45 }
 0x14f   :  { %v737_v58 = vmul.f32 0.25, %v705_v54 }
 0x150   :  { %v753_v59 = vmul.f32 0.25, %v721_v55 }
 0x155   :  { %v642_v51 = vld [vmem:[%s1393_s2 + $0x58] sm:$0xff] }
 0x156   :  { %v658_v53 = vld [vmem:[%s1393_s2 + $0xd8] sm:$0xff]  ;;  %v706_v60 = vadd.f32 %v894_v56, %v642_v51 }
 0x157   :  { %v722_v61 = vadd.f32 %v942_v57, %v658_v53  ;;  %769 = vst [vmem:[%s1394_s3 + $0x50] sm:$0xff] %v737_v58  ;;  %785 = vst [vmem:[%s1394_s3 + $0xd0] sm:$0xff] %v753_v59 }
 0x158   :  { %v738_v62 = vmul.f32 0.25, %v706_v60 }
 0x159   :  { %v754_v63 = vmul.f32 0.25, %v722_v61 }
 0x15e   :  { %v643_v3 = vld [vmem:[%s1393_s2 + $0x60] sm:$0xff] }
 0x15f   :  { %v659_v5 = vld [vmem:[%s1393_s2 + $0xe0] sm:$0xff]  ;;  %v707_v14 = vadd.f32 %v897_v6, %v643_v3 }
 0x160   :  { %770 = vst [vmem:[%s1394_s3 + $0x58] sm:$0xff] %v738_v62  ;;  %786 = vst [vmem:[%s1394_s3 + $0xd8] sm:$0xff] %v754_v63  ;;  %v723_v15 = vadd.f32 %v945_v7, %v659_v5 }
 0x161   :  { %v739_v18 = vmul.f32 0.25, %v707_v14 }
 0x162   :  { %v755_v19 = vmul.f32 0.25, %v723_v15 }
 0x167   :  { %v644_v11 = vld [vmem:[%s1393_s2 + $0x68] sm:$0xff] }
 0x168   :  { %v660_v13 = vld [vmem:[%s1393_s2 + $0xe8] sm:$0xff]  ;;  %v708_v20 = vadd.f32 %v900_v16, %v644_v11 }
 0x169   :  { %v724_v21 = vadd.f32 %v948_v17, %v660_v13  ;;  %771 = vst [vmem:[%s1394_s3 + $0x60] sm:$0xff] %v739_v18  ;;  %787 = vst [vmem:[%s1394_s3 + $0xe0] sm:$0xff] %v755_v19 }
 0x16a   :  { %v740_v22 = vmul.f32 0.25, %v708_v20 }
 0x16b   :  { %v756_v23 = vmul.f32 0.25, %v724_v21 }
 0x170   :  { %v645_v27 = vld [vmem:[%s1393_s2 + $0x70] sm:$0xff] }
 0x171   :  { %v661_v29 = vld [vmem:[%s1393_s2 + $0xf0] sm:$0xff]  ;;  %v709_v38 = vadd.f32 %v903_v30, %v645_v27 }
 0x172   :  { %772 = vst [vmem:[%s1394_s3 + $0x68] sm:$0xff] %v740_v22  ;;  %788 = vst [vmem:[%s1394_s3 + $0xe8] sm:$0xff] %v756_v23  ;;  %v725_v39 = vadd.f32 %v951_v31, %v661_v29 }
 0x173   :  { %v741_v42 = vmul.f32 0.25, %v709_v38 }
 0x174   :  { %v757_v43 = vmul.f32 0.25, %v725_v39 }
 0x179   :  { %v646_v35 = vld [vmem:[%s1393_s2 + $0x78] sm:$0xff] }
 0x17a   :  { %v662_v37 = vld [vmem:[%s1393_s2 + $0xf8] sm:$0xff]  ;;  %v710_v44 = vadd.f32 %v906_v40, %v646_v35 }
 0x17b   :  { %v726_v45 = vadd.f32 %v954_v41, %v662_v37  ;;  %773 = vst [vmem:[%s1394_s3 + $0x70] sm:$0xff] %v741_v42  ;;  %789 = vst [vmem:[%s1394_s3 + $0xf0] sm:$0xff] %v757_v43 }
 0x17c   :  { %v742_v46 = vmul.f32 0.25, %v710_v44 }
 0x17d   :  { %v758_v47 = vmul.f32 0.25, %v726_v45 }
 0x17e   :  { %774 = vst [vmem:[%s1394_s3 + $0x78] sm:$0xff] %v742_v46 }
 0x17f   :  { %790 = vst [vmem:[%s1394_s3 + $0xf8] sm:$0xff] %v758_v47 }

// kernel: lightgcn_forward.3
= control target key start
LH: loop header
LB: loop body
LE: loop exit
PB: predicated region body
PF: predicated region fallthrough
CT: control target
= control target key end

     0   :  { %s1737_s1 = inlined_call_operand.vmem [shape: bf16[256,128], index: 1, kind: input, shape index: {}]   ;;  %s1738_s0 = inlined_call_operand.vmem [shape: bf16[256,256], index: 0, kind: input, shape index: {}]   ;;  %s1739_s2 = inlined_call_operand.vmem [shape: f32[256,128], index: 2, kind: input, shape index: {}, may-alias: {2,4}]   ;;  %s1740_s4 = inlined_call_operand.vmem [shape: f32[256,128], index: 4, kind: output, shape index: {1}, may-alias: {2,4}]   ;;  %s1741_s3 = inlined_call_operand.vmem [shape: bf16[256,128], index: 3, kind: output, shape index: {0}]  }
   0x1   :  { %v1264_v0 = vld [vmem:[%s1737_s1 + $0x40] sm:$0xff]   ;;  %v1266_v2 = vld [vmem:[%s1737_s1 + $0x48] sm:$0xff]   ;;  %v1268_v4 = vld [vmem:[%s1737_s1 + $0x50] sm:$0xff]  }
   0x2   :  { %v1265_v1 = vld [vmem:[%s1737_s1] sm:$0xff]   ;;  %1136 = vmatprep.subr.bf16.mxu0 %v1264_v0  ;;  %1248 = vmatprep.subr.bf16.mxu1 %v1264_v0  ;;  %v1267_v3 = vld [vmem:[%s1737_s1 + $0x8] sm:$0xff]   ;;  %v1269_v5 = vld [vmem:[%s1737_s1 + $0x10] sm:$0xff]  }
   0x3   :  { %1137 = vmatpush3.bf16.msra.mxu0 %v1265_v1  ;;  %1256 = vmatpush3.bf16.msra.mxu1 %v1265_v1  ;;  %v1270_v6 = vld [vmem:[%s1737_s1 + $0x58] sm:$0xff]   ;;  %v1272_v8 = vld [vmem:[%s1737_s1 + $0x60] sm:$0xff]   ;;  %v1274_v10 = vld [vmem:[%s1737_s1 + $0x68] sm:$0xff]  }
   0x4   :  { %1138 = vmatprep.subr.bf16.mxu0 %v1266_v2  ;;  %1249 = vmatprep.subr.bf16.mxu1 %v1266_v2  ;;  %v1271_v7 = vld [vmem:[%s1737_s1 + $0x18] sm:$0xff]   ;;  %v1273_v9 = vld [vmem:[%s1737_s1 + $0x20] sm:$0xff]   ;;  %v1275_v13 = vld [vmem:[%s1737_s1 + $0x28] sm:$0xff]  }
   0x5   :  { %v1282_v11 = vld [vmem:[%s1738_s0 + $0x4] ss:$8 sps:$4 sm:$0xff]   ;;  %v1276_v14 = vld [vmem:[%s1737_s1 + $0x70] sm:$0xff]   ;;  %v1278_v16 = vld [vmem:[%s1737_s1 + $0x78] sm:$0xff]  }
   0x6   :  { %v1285_v12 = vld [vmem:[%s1738_s0 + $0x84] ss:$8 sps:$4 sm:$0xff]   ;;  %437 = vmatprep.mubr.bf16.mxu0 %v1282_v11  ;;  %v1277_v15 = vld [vmem:[%s1737_s1 + $0x30] sm:$0xff]   ;;  %v1279_v17 = vld [vmem:[%s1737_s1 + $0x38] sm:$0xff]  }
   0x7   :  { %1139 = vmatpush3.bf16.msra.mxu0 %v1267_v3  ;;  %1257 = vmatpush3.bf16.msra.mxu1 %v1267_v3  ;;  %v1280_v18 = vld [vmem:[%s1738_s0] ss:$8 sps:$4 sm:$0xff]   ;;  %v1286_v20 = vld [vmem:[%s1738_s0 + $0x14] ss:$8 sps:$4 sm:$0xff]   ;;  %v1290_v22 = vld [vmem:[%s1738_s0 + $0x10] ss:$8 sps:$4 sm:$0xff]  }
   0x8   :  { %1140 = vmatprep.subr.bf16.mxu0 %v1268_v4  ;;  %1250 = vmatprep.subr.bf16.mxu1 %v1268_v4  ;;  %v1283_v19 = vld [vmem:[%s1738_s0 + $0x80] ss:$8 sps:$4 sm:$0xff]   ;;  %v1288_v21 = vld [vmem:[%s1738_s0 + $0x94] ss:$8 sps:$4 sm:$0xff]   ;;  %v1291_v23 = vld [vmem:[%s1738_s0 + $0x90] ss:$8 sps:$4 sm:$0xff]  }
   0x9   :  { %501 = vmatprep.mubr.bf16.mxu1 %v1285_v12  ;;  %v1292_v24 = vld [vmem:[%s1738_s0 + $0x24] ss:$8 sps:$4 sm:$0xff]   ;;  %v1296_v26 = vld [vmem:[%s1738_s0 + $0x20] ss:$8 sps:$4 sm:$0xff]   ;;  %v1298_v28 = vld [vmem:[%s1738_s0 + $0x34] ss:$8 sps:$4 sm:$0xff]  }
   0xa   :  { %v1294_v25 = vld [vmem:[%s1738_s0 + $0xa4] ss:$8 sps:$4 sm:$0xff]   ;;  %v1297_v27 = vld [vmem:[%s1738_s0 + $0xa0] ss:$8 sps:$4 sm:$0xff]   ;;  %v1300_v29 = vld [vmem:[%s1738_s0 + $0xb4] ss:$8 sps:$4 sm:$0xff]  }
   0xb   :  { %1141 = vmatpush3.bf16.msra.mxu0 %v1269_v5  ;;  %1258 = vmatpush3.bf16.msra.mxu1 %v1269_v5  ;;  %v1302_v30 = vld [vmem:[%s1738_s0 + $0x30] ss:$8 sps:$4 sm:$0xff]   ;;  %v1304_v32 = vld [vmem:[%s1738_s0 + $0x44] ss:$8 sps:$4 sm:$0xff]   ;;  %v1308_v34 = vld [vmem:[%s1738_s0 + $0x40] ss:$8 sps:$4 sm:$0xff]  }
   0xc   :  { %1142 = vmatprep.subr.bf16.mxu0 %v1270_v6  ;;  %1251 = vmatprep.subr.bf16.mxu1 %v1270_v6  ;;  %v1303_v31 = vld [vmem:[%s1738_s0 + $0xb0] ss:$8 sps:$4 sm:$0xff]   ;;  %v1306_v33 = vld [vmem:[%s1738_s0 + $0xc4] ss:$8 sps:$4 sm:$0xff]   ;;  %v1309_v35 = vld [vmem:[%s1738_s0 + $0xc0] ss:$8 sps:$4 sm:$0xff]  }
   0xd   :  { %v1310_v36 = vld [vmem:[%s1738_s0 + $0x54] ss:$8 sps:$4 sm:$0xff]   ;;  %v1314_v38 = vld [vmem:[%s1738_s0 + $0x50] ss:$8 sps:$4 sm:$0xff]   ;;  %v1316_v40 = vld [vmem:[%s1738_s0 + $0x64] ss:$8 sps:$4 sm:$0xff]  }
   0xe   :  { %v1312_v37 = vld [vmem:[%s1738_s0 + $0xd4] ss:$8 sps:$4 sm:$0xff]   ;;  %v1315_v39 = vld [vmem:[%s1738_s0 + $0xd0] ss:$8 sps:$4 sm:$0xff]   ;;  %v1318_v41 = vld [vmem:[%s1738_s0 + $0xe4] ss:$8 sps:$4 sm:$0xff]  }
   0xf   :  { %1143 = vmatpush3.bf16.msra.mxu0 %v1271_v7  ;;  %1259 = vmatpush3.bf16.msra.mxu1 %v1271_v7  ;;  %v1320_v42 = vld [vmem:[%s1738_s0 + $0x60] ss:$8 sps:$4 sm:$0xff]   ;;  %v1322_v44 = vld [vmem:[%s1738_s0 + $0x74] ss:$8 sps:$4 sm:$0xff]   ;;  %v1326_v46 = vld [vmem:[%s1738_s0 + $0x70] ss:$8 sps:$4 sm:$0xff]  }
  0x10   :  { %1144 = vmatprep.subr.bf16.mxu0 %v1272_v8  ;;  %1252 = vmatprep.subr.bf16.mxu1 %v1272_v8  ;;  %v1321_v43 = vld [vmem:[%s1738_s0 + $0xe0] ss:$8 sps:$4 sm:$0xff]   ;;  %v1324_v45 = vld [vmem:[%s1738_s0 + $0xf4] ss:$8 sps:$4 sm:$0xff]   ;;  %v1327_v47 = vld [vmem:[%s1738_s0 + $0xf0] ss:$8 sps:$4 sm:$0xff]  }
  0x11   :  { %v825_v51 = vld [vmem:[%s1739_s2] sm:$0xff]  ;;  %v826_v59 = vld [vmem:[%s1739_s2 + $0x8] sm:$0xff] }
  0x12   :  { %v841_v53 = vld [vmem:[%s1739_s2 + $0x80] sm:$0xff]  ;;  %v842_v61 = vld [vmem:[%s1739_s2 + $0x88] sm:$0xff] }
  0x13   :  { %1145 = vmatpush3.bf16.msra.mxu0 %v1273_v9  ;;  %1260 = vmatpush3.bf16.msra.mxu1 %v1273_v9 }
  0x14   :  { %1146 = vmatprep.subr.bf16.mxu0 %v1274_v10  ;;  %1253 = vmatprep.subr.bf16.mxu1 %v1274_v10 }
  0x17   :  { %1147 = vmatpush3.bf16.msra.mxu0 %v1275_v13  ;;  %1261 = vmatpush3.bf16.msra.mxu1 %v1275_v13 }
  0x18   :  { %1148 = vmatprep.subr.bf16.mxu0 %v1276_v14  ;;  %1254 = vmatprep.subr.bf16.mxu1 %v1276_v14 }
  0x1b   :  { %1149 = vmatpush3.bf16.msra.mxu0 %v1277_v15  ;;  %1262 = vmatpush3.bf16.msra.mxu1 %v1277_v15 }
  0x1c   :  { %1150 = vmatprep.subr.bf16.mxu0 %v1278_v16  ;;  %1255 = vmatprep.subr.bf16.mxu1 %v1278_v16 }
  0x1f   :  { %1151 = vmatpush3.bf16.msra.mxu0 %v1279_v17  ;;  %1263 = vmatpush3.bf16.msra.mxu1 %v1279_v17 }
  0x22   :  { %438 = vmatmul.mubr.bf16.vlgmr.msra.gmra.mrb[0].mxu0 %v1280_v18  ;;  %502 = vmatmul.mubr.bf16.vlgmr.msra.gmra.mrb[0].mxu1 %v1283_v19 }
  0x23   :  { %445 = vmatprep.mubr.bf16.mxu0 %v1286_v20  ;;  %509 = vmatprep.mubr.bf16.mxu1 %v1288_v21 }
  0x2a   :  { %446 = vmatmul.mubr.bf16.gmra.mrb[4].mxu0 %v1290_v22  ;;  %510 = vmatmul.mubr.bf16.gmra.mrb[4].mxu1 %v1291_v23 }
  0x2b   :  { %453 = vmatprep.mubr.bf16.mxu0 %v1292_v24  ;;  %517 = vmatprep.mubr.bf16.mxu1 %v1294_v25 }
  0x32   :  { %454 = vmatmul.mubr.bf16.gmra.mrb[8].mxu0 %v1296_v26  ;;  %518 = vmatmul.mubr.bf16.gmra.mrb[8].mxu1 %v1297_v27 }
  0x33   :  { %461 = vmatprep.mubr.bf16.mxu0 %v1298_v28  ;;  %525 = vmatprep.mubr.bf16.mxu1 %v1300_v29 }
  0x3a   :  { %462 = vmatmul.mubr.bf16.gmra.mrb[12].mxu0 %v1302_v30  ;;  %526 = vmatmul.mubr.bf16.gmra.mrb[12].mxu1 %v1303_v31 }
  0x3b   :  { %469 = vmatprep.mubr.bf16.mxu0 %v1304_v32  ;;  %533 = vmatprep.mubr.bf16.mxu1 %v1306_v33 }
  0x42   :  { %470 = vmatmul.mubr.bf16.gmra.mrb[16].mxu0 %v1308_v34  ;;  %534 = vmatmul.mubr.bf16.gmra.mrb[16].mxu1 %v1309_v35 }
  0x43   :  { %477 = vmatprep.mubr.bf16.mxu0 %v1310_v36  ;;  %541 = vmatprep.mubr.bf16.mxu1 %v1312_v37 }
  0x4a   :  { %478 = vmatmul.mubr.bf16.gmra.mrb[20].mxu0 %v1314_v38  ;;  %542 = vmatmul.mubr.bf16.gmra.mrb[20].mxu1 %v1315_v39 }
  0x4b   :  { %485 = vmatprep.mubr.bf16.mxu0 %v1316_v40  ;;  %549 = vmatprep.mubr.bf16.mxu1 %v1318_v41 }
  0x52   :  { %486 = vmatmul.mubr.bf16.gmra.mrb[24].mxu0 %v1320_v42  ;;  %550 = vmatmul.mubr.bf16.gmra.mrb[24].mxu1 %v1321_v43 }
  0x53   :  { %493 = vmatprep.mubr.bf16.mxu0 %v1322_v44  ;;  %557 = vmatprep.mubr.bf16.mxu1 %v1324_v45 }
  0x5a   :  { %494 = vmatmul.mubr.bf16.gmra.mrb[28].mxu0 %v1326_v46  ;;  %558 = vmatmul.mubr.bf16.gmra.mrb[28].mxu1 %v1327_v47 }
  0xf5   :  { %v1152_v48 = vpop.f32.mrb[0].mxu0  ;;  %v1200_v49 = vpop.f32.mrb[0].mxu1 }
  0xf6   :  { %v1153_v50 = vpop.f32.mrb[1].mxu0  ;;  %v1201_v52 = vpop.f32.mrb[1].mxu1 }
  0xf7   :  { %v1154_v54 = vadd.f32 %v1153_v50, %v1152_v48  ;;  %v1202_v55 = vadd.f32 %v1201_v52, %v1200_v49  ;;  %v1155_v56 = vpop.f32.mrb[2].mxu0  ;;  %v1203_v57 = vpop.f32.mrb[2].mxu1 }
  0xf8   :  { %v1156_v58 = vpop.f32.mrb[3].mxu0  ;;  %v1204_v60 = vpop.f32.mrb[3].mxu1 }
  0xf9   :  { %v857_v62 = vadd.f32 %v1154_v54, %v825_v51  ;;  %v873_v63 = vadd.f32 %v1202_v55, %v841_v53  ;;  %v1157_v0 = vadd.f32 %v1156_v58, %v1155_v56  ;;  %v1205_v1 = vadd.f32 %v1204_v60, %v1203_v57 }
  0xfb   :  { %889 = vst [vmem:[%s1740_s4] sm:$0xff] %v857_v62  ;;  %905 = vst [vmem:[%s1740_s4 + $0x80] sm:$0xff] %v873_v63  ;;  %v1044_v2 = vpack.c.bf16 %v1157_v0, %v1154_v54  ;;  %v858_v3 = vadd.f32 %v1157_v0, %v826_v59  ;;  %v1084_v4 = vpack.c.bf16 %v1205_v1, %v1202_v55 }
  0xfc   :  { %v874_v5 = vadd.f32 %v1205_v1, %v842_v61 }
  0xfd   :  { %1045 = vst [vmem:[%s1741_s3] sm:$0xff] %v1044_v2   ;;  %890 = vst [vmem:[%s1740_s4 + $0x8] sm:$0xff] %v858_v3  ;;  %v1158_v6 = vpop.f32.mrb[4].mxu0  ;;  %v1206_v7 = vpop.f32.mrb[4].mxu1 }
  0xfe   :  { %1128 = vst [vmem:[%s1741_s3 + $0x40] sm:$0xff] %v1084_v4   ;;  %906 = vst [vmem:[%s1740_s4 + $0x88] sm:$0xff] %v874_v5  ;;  %v1159_v8 = vpop.f32.mrb[5].mxu0  ;;  %v1207_v10 = vpop.f32.mrb[5].mxu1 }
  0xff   :  { %v1160_v12 = vadd.f32 %v1159_v8, %v1158_v6  ;;  %v1208_v13 = vadd.f32 %v1207_v10, %v1206_v7  ;;  %v1161_v14 = vpop.f32.mrb[6].mxu0  ;;  %v1209_v15 = vpop.f32.mrb[6].mxu1 }
 0x100   :  { %v1162_v16 = vpop.f32.mrb[7].mxu0  ;;  %v1210_v18 = vpop.f32.mrb[7].mxu1 }
 0x101   :  { %v1163_v22 = vadd.f32 %v1162_v16, %v1161_v14  ;;  %v1211_v23 = vadd.f32 %v1210_v18, %v1209_v15 }
 0x103   :  { %v1049_v24 = vpack.c.bf16 %v1163_v22, %v1160_v12  ;;  %v1089_v26 = vpack.c.bf16 %v1211_v23, %v1208_v13 }
 0x105   :  { %v827_v9 = vld [vmem:[%s1739_s2 + $0x10] sm:$0xff]  ;;  %v828_v17 = vld [vmem:[%s1739_s2 + $0x18] sm:$0xff]  ;;  %1121 = vst [vmem:[%s1741_s3 + $0x8] sm:$0xff] %v1049_v24   ;;  %1129 = vst [vmem:[%s1741_s3 + $0x48] sm:$0xff] %v1089_v26   ;;  %v1164_v28 = vpop.f32.mrb[8].mxu0  ;;  %v1212_v29 = vpop.f32.mrb[8].mxu1 }
 0x106   :  { %v843_v11 = vld [vmem:[%s1739_s2 + $0x90] sm:$0xff]  ;;  %v844_v19 = vld [vmem:[%s1739_s2 + $0x98] sm:$0xff]  ;;  %v859_v20 = vadd.f32 %v1160_v12, %v827_v9  ;;  %v860_v25 = vadd.f32 %v1163_v22, %v828_v17  ;;  %v1165_v30 = vpop.f32.mrb[9].mxu0  ;;  %v1213_v32 = vpop.f32.mrb[9].mxu1 }
 0x107   :  { %v875_v21 = vadd.f32 %v1208_v13, %v843_v11  ;;  %v876_v27 = vadd.f32 %v1211_v23, %v844_v19  ;;  %v1166_v34 = vadd.f32 %v1165_v30, %v1164_v28  ;;  %v1214_v35 = vadd.f32 %v1213_v32, %v1212_v29  ;;  %v1167_v36 = vpop.f32.mrb[10].mxu0  ;;  %v1215_v37 = vpop.f32.mrb[10].mxu1 }
 0x108   :  { %891 = vst [vmem:[%s1740_s4 + $0x10] sm:$0xff] %v859_v20  ;;  %892 = vst [vmem:[%s1740_s4 + $0x18] sm:$0xff] %v860_v25  ;;  %v1168_v38 = vpop.f32.mrb[11].mxu0  ;;  %v1216_v40 = vpop.f32.mrb[11].mxu1 }
 0x109   :  { %907 = vst [vmem:[%s1740_s4 + $0x90] sm:$0xff] %v875_v21  ;;  %908 = vst [vmem:[%s1740_s4 + $0x98] sm:$0xff] %v876_v27  ;;  %v1169_v44 = vadd.f32 %v1168_v38, %v1167_v36  ;;  %v1217_v45 = vadd.f32 %v1216_v40, %v1215_v37 }
 0x10b   :  { %v1054_v46 = vpack.c.bf16 %v1169_v44, %v1166_v34  ;;  %v1094_v48 = vpack.c.bf16 %v1217_v45, %v1214_v35 }
 0x10d   :  { %1122 = vst [vmem:[%s1741_s3 + $0x10] sm:$0xff] %v1054_v46   ;;  %1130 = vst [vmem:[%s1741_s3 + $0x50] sm:$0xff] %v1094_v48   ;;  %v1170_v50 = vpop.f32.mrb[12].mxu0  ;;  %v1218_v51 = vpop.f32.mrb[12].mxu1 }
 0x10e   :  { %v1171_v52 = vpop.f32.mrb[13].mxu0  ;;  %v1219_v54 = vpop.f32.mrb[13].mxu1 }
 0x10f   :  { %v1172_v56 = vadd.f32 %v1171_v52, %v1170_v50  ;;  %v1220_v57 = vadd.f32 %v1219_v54, %v1218_v51  ;;  %v1173_v58 = vpop.f32.mrb[14].mxu0  ;;  %v1221_v59 = vpop.f32.mrb[14].mxu1 }
 0x110   :  { %v829_v31 = vld [vmem:[%s1739_s2 + $0x20] sm:$0xff]  ;;  %v830_v39 = vld [vmem:[%s1739_s2 + $0x28] sm:$0xff]  ;;  %v1174_v60 = vpop.f32.mrb[15].mxu0  ;;  %v1222_v62 = vpop.f32.mrb[15].mxu1 }
 0x111   :  { %v845_v33 = vld [vmem:[%s1739_s2 + $0xa0] sm:$0xff]  ;;  %v846_v41 = vld [vmem:[%s1739_s2 + $0xa8] sm:$0xff]  ;;  %v861_v42 = vadd.f32 %v1166_v34, %v829_v31  ;;  %v862_v47 = vadd.f32 %v1169_v44, %v830_v39  ;;  %v1175_v2 = vadd.f32 %v1174_v60, %v1173_v58  ;;  %v1223_v3 = vadd.f32 %v1222_v62, %v1221_v59 }
 0x112   :  { %v877_v43 = vadd.f32 %v1214_v35, %v845_v33  ;;  %v878_v49 = vadd.f32 %v1217_v45, %v846_v41 }
 0x113   :  { %893 = vst [vmem:[%s1740_s4 + $0x20] sm:$0xff] %v861_v42  ;;  %894 = vst [vmem:[%s1740_s4 + $0x28] sm:$0xff] %v862_v47  ;;  %v1059_v4 = vpack.c.bf16 %v1175_v2, %v1172_v56  ;;  %v1099_v6 = vpack.c.bf16 %v1223_v3, %v1220_v57 }
 0x114   :  { %909 = vst [vmem:[%s1740_s4 + $0xa0] sm:$0xff] %v877_v43  ;;  %910 = vst [vmem:[%s1740_s4 + $0xa8] sm:$0xff] %v878_v49 }
 0x115   :  { %1123 = vst [vmem:[%s1741_s3 + $0x18] sm:$0xff] %v1059_v4   ;;  %1131 = vst [vmem:[%s1741_s3 + $0x58] sm:$0xff] %v1099_v6   ;;  %v1176_v8 = vpop.f32.mrb[16].mxu0  ;;  %v1224_v9 = vpop.f32.mrb[16].mxu1 }
 0x116   :  { %v1177_v10 = vpop.f32.mrb[17].mxu0  ;;  %v1225_v12 = vpop.f32.mrb[17].mxu1 }
 0x117   :  { %v1178_v14 = vadd.f32 %v1177_v10, %v1176_v8  ;;  %v1226_v15 = vadd.f32 %v1225_v12, %v1224_v9  ;;  %v1179_v16 = vpop.f32.mrb[18].mxu0  ;;  %v1227_v17 = vpop.f32.mrb[18].mxu1 }
 0x118   :  { %v1180_v18 = vpop.f32.mrb[19].mxu0  ;;  %v1228_v20 = vpop.f32.mrb[19].mxu1 }
 0x119   :  { %v1181_v24 = vadd.f32 %v1180_v18, %v1179_v16  ;;  %v1229_v25 = vadd.f32 %v1228_v20, %v1227_v17 }
 0x11b   :  { %v831_v53 = vld [vmem:[%s1739_s2 + $0x30] sm:$0xff]  ;;  %v832_v61 = vld [vmem:[%s1739_s2 + $0x38] sm:$0xff]  ;;  %v1064_v26 = vpack.c.bf16 %v1181_v24, %v1178_v14  ;;  %v1104_v28 = vpack.c.bf16 %v1229_v25, %v1226_v15 }
 0x11c   :  { %v847_v55 = vld [vmem:[%s1739_s2 + $0xb0] sm:$0xff]  ;;  %v848_v63 = vld [vmem:[%s1739_s2 + $0xb8] sm:$0xff]  ;;  %v863_v0 = vadd.f32 %v1172_v56, %v831_v53  ;;  %v864_v5 = vadd.f32 %v1175_v2, %v832_v61 }
 0x11d   :  { %v879_v1 = vadd.f32 %v1220_v57, %v847_v55  ;;  %v880_v7 = vadd.f32 %v1223_v3, %v848_v63  ;;  %1124 = vst [vmem:[%s1741_s3 + $0x20] sm:$0xff] %v1064_v26   ;;  %1132 = vst [vmem:[%s1741_s3 + $0x60] sm:$0xff] %v1104_v28   ;;  %v1182_v30 = vpop.f32.mrb[20].mxu0  ;;  %v1230_v31 = vpop.f32.mrb[20].mxu1 }
 0x11e   :  { %895 = vst [vmem:[%s1740_s4 + $0x30] sm:$0xff] %v863_v0  ;;  %896 = vst [vmem:[%s1740_s4 + $0x38] sm:$0xff] %v864_v5  ;;  %v1183_v32 = vpop.f32.mrb[21].mxu0  ;;  %v1231_v34 = vpop.f32.mrb[21].mxu1 }
 0x11f   :  { %911 = vst [vmem:[%s1740_s4 + $0xb0] sm:$0xff] %v879_v1  ;;  %912 = vst [vmem:[%s1740_s4 + $0xb8] sm:$0xff] %v880_v7  ;;  %v1184_v36 = vadd.f32 %v1183_v32, %v1182_v30  ;;  %v1232_v37 = vadd.f32 %v1231_v34, %v1230_v31  ;;  %v1185_v38 = vpop.f32.mrb[22].mxu0  ;;  %v1233_v39 = vpop.f32.mrb[22].mxu1 }
 0x120   :  { %v1186_v40 = vpop.f32.mrb[23].mxu0  ;;  %v1234_v42 = vpop.f32.mrb[23].mxu1 }
 0x121   :  { %v1187_v46 = vadd.f32 %v1186_v40, %v1185_v38  ;;  %v1235_v47 = vadd.f32 %v1234_v42, %v1233_v39 }
 0x123   :  { %v1069_v48 = vpack.c.bf16 %v1187_v46, %v1184_v36  ;;  %v1109_v50 = vpack.c.bf16 %v1235_v47, %v1232_v37 }
 0x125   :  { %1125 = vst [vmem:[%s1741_s3 + $0x28] sm:$0xff] %v1069_v48   ;;  %1133 = vst [vmem:[%s1741_s3 + $0x68] sm:$0xff] %v1109_v50   ;;  %v1188_v52 = vpop.f32.mrb[24].mxu0  ;;  %v1236_v53 = vpop.f32.mrb[24].mxu1 }
 0x126   :  { %v833_v11 = vld [vmem:[%s1739_s2 + $0x40] sm:$0xff]  ;;  %v834_v19 = vld [vmem:[%s1739_s2 + $0x48] sm:$0xff]  ;;  %v1189_v54 = vpop.f32.mrb[25].mxu0  ;;  %v1237_v56 = vpop.f32.mrb[25].mxu1 }
 0x127   :  { %v849_v13 = vld [vmem:[%s1739_s2 + $0xc0] sm:$0xff]  ;;  %v850_v21 = vld [vmem:[%s1739_s2 + $0xc8] sm:$0xff]  ;;  %v865_v22 = vadd.f32 %v1178_v14, %v833_v11  ;;  %v866_v27 = vadd.f32 %v1181_v24, %v834_v19  ;;  %v1190_v58 = vadd.f32 %v1189_v54, %v1188_v52  ;;  %v1238_v59 = vadd.f32 %v1237_v56, %v1236_v53  ;;  %v1191_v60 = vpop.f32.mrb[26].mxu0  ;;  %v1239_v61 = vpop.f32.mrb[26].mxu1 }
 0x128   :  { %v881_v23 = vadd.f32 %v1226_v15, %v849_v13  ;;  %v882_v29 = vadd.f32 %v1229_v25, %v850_v21  ;;  %v1192_v62 = vpop.f32.mrb[27].mxu0  ;;  %v1240_v0 = vpop.f32.mrb[27].mxu1 }
 0x129   :  { %897 = vst [vmem:[%s1740_s4 + $0x40] sm:$0xff] %v865_v22  ;;  %898 = vst [vmem:[%s1740_s4 + $0x48] sm:$0xff] %v866_v27  ;;  %v1193_v4 = vadd.f32 %v1192_v62, %v1191_v60  ;;  %v1241_v5 = vadd.f32 %v1240_v0, %v1239_v61 }
 0x12a   :  { %913 = vst [vmem:[%s1740_s4 + $0xc0] sm:$0xff] %v881_v23  ;;  %914 = vst [vmem:[%s1740_s4 + $0xc8] sm:$0xff] %v882_v29 }
 0x12b   :  { %v1074_v6 = vpack.c.bf16 %v1193_v4, %v1190_v58  ;;  %v1114_v8 = vpack.c.bf16 %v1241_v5, %v1238_v59 }
 0x12d   :  { %1126 = vst [vmem:[%s1741_s3 + $0x30] sm:$0xff] %v1074_v6   ;;  %1134 = vst [vmem:[%s1741_s3 + $0x70] sm:$0xff] %v1114_v8   ;;  %v1194_v10 = vpop.f32.mrb[28].mxu0  ;;  %v1242_v11 = vpop.f32.mrb[28].mxu1 }
 0x12e   :  { %v1195_v12 = vpop.f32.mrb[29].mxu0  ;;  %v1243_v14 = vpop.f32.mrb[29].mxu1 }
 0x12f   :  { %v1196_v16 = vadd.f32 %v1195_v12, %v1194_v10  ;;  %v1244_v17 = vadd.f32 %v1243_v14, %v1242_v11  ;;  %v1197_v18 = vpop.f32.mrb[30].mxu0  ;;  %v1245_v19 = vpop.f32.mrb[30].mxu1 }
 0x130   :  { %v1198_v20 = vpop.f32.mrb[31].mxu0  ;;  %v1246_v22 = vpop.f32.mrb[31].mxu1 }
 0x131   :  { %v835_v33 = vld [vmem:[%s1739_s2 + $0x50] sm:$0xff]  ;;  %v836_v41 = vld [vmem:[%s1739_s2 + $0x58] sm:$0xff]  ;;  %v1199_v26 = vadd.f32 %v1198_v20, %v1197_v18  ;;  %v1247_v27 = vadd.f32 %v1246_v22, %v1245_v19 }
 0x132   :  { %v851_v35 = vld [vmem:[%s1739_s2 + $0xd0] sm:$0xff]  ;;  %v852_v43 = vld [vmem:[%s1739_s2 + $0xd8] sm:$0xff]  ;;  %v867_v44 = vadd.f32 %v1184_v36, %v835_v33  ;;  %v868_v49 = vadd.f32 %v1187_v46, %v836_v41 }
 0x133   :  { %v883_v45 = vadd.f32 %v1232_v37, %v851_v35  ;;  %v884_v51 = vadd.f32 %v1235_v47, %v852_v43  ;;  %v1079_v28 = vpack.c.bf16 %v1199_v26, %v1196_v16  ;;  %v1119_v30 = vpack.c.bf16 %v1247_v27, %v1244_v17 }
 0x134   :  { %899 = vst [vmem:[%s1740_s4 + $0x50] sm:$0xff] %v867_v44  ;;  %900 = vst [vmem:[%s1740_s4 + $0x58] sm:$0xff] %v868_v49 }
 0x135   :  { %915 = vst [vmem:[%s1740_s4 + $0xd0] sm:$0xff] %v883_v45  ;;  %916 = vst [vmem:[%s1740_s4 + $0xd8] sm:$0xff] %v884_v51 }
 0x136   :  { %1127 = vst [vmem:[%s1741_s3 + $0x38] sm:$0xff] %v1079_v28   ;;  %1135 = vst [vmem:[%s1741_s3 + $0x78] sm:$0xff] %v1119_v30  }
 0x13c   :  { %v837_v55 = vld [vmem:[%s1739_s2 + $0x60] sm:$0xff]  ;;  %v838_v63 = vld [vmem:[%s1739_s2 + $0x68] sm:$0xff] }
 0x13d   :  { %v853_v57 = vld [vmem:[%s1739_s2 + $0xe0] sm:$0xff]  ;;  %v854_v1 = vld [vmem:[%s1739_s2 + $0xe8] sm:$0xff]  ;;  %v869_v2 = vadd.f32 %v1190_v58, %v837_v55  ;;  %v870_v7 = vadd.f32 %v1193_v4, %v838_v63 }
 0x13e   :  { %v885_v3 = vadd.f32 %v1238_v59, %v853_v57  ;;  %v886_v9 = vadd.f32 %v1241_v5, %v854_v1 }
 0x13f   :  { %901 = vst [vmem:[%s1740_s4 + $0x60] sm:$0xff] %v869_v2  ;;  %902 = vst [vmem:[%s1740_s4 + $0x68] sm:$0xff] %v870_v7 }
 0x140   :  { %917 = vst [vmem:[%s1740_s4 + $0xe0] sm:$0xff] %v885_v3  ;;  %918 = vst [vmem:[%s1740_s4 + $0xe8] sm:$0xff] %v886_v9 }
 0x147   :  { %v839_v13 = vld [vmem:[%s1739_s2 + $0x70] sm:$0xff]  ;;  %v840_v21 = vld [vmem:[%s1739_s2 + $0x78] sm:$0xff] }
 0x148   :  { %v855_v15 = vld [vmem:[%s1739_s2 + $0xf0] sm:$0xff]  ;;  %v856_v23 = vld [vmem:[%s1739_s2 + $0xf8] sm:$0xff]  ;;  %v871_v24 = vadd.f32 %v1196_v16, %v839_v13  ;;  %v872_v29 = vadd.f32 %v1199_v26, %v840_v21 }
 0x149   :  { %v887_v25 = vadd.f32 %v1244_v17, %v855_v15  ;;  %v888_v31 = vadd.f32 %v1247_v27, %v856_v23 }
 0x14a   :  { %903 = vst [vmem:[%s1740_s4 + $0x70] sm:$0xff] %v871_v24  ;;  %904 = vst [vmem:[%s1740_s4 + $0x78] sm:$0xff] %v872_v29 }
 0x14b   :  { %919 = vst [vmem:[%s1740_s4 + $0xf0] sm:$0xff] %v887_v25  ;;  %920 = vst [vmem:[%s1740_s4 + $0xf8] sm:$0xff] %v888_v31 }

</bundles_post_ra>
